<compile_context>
chip_gen: v5e
topology: v5e:2x2
jax: 0.10.0
libtpu: 0.0.40
codegen_flags: <defaults>
</compile_context>

<pallas_src>
import jax
import jax.numpy as jnp
from jax.experimental import pallas as pl
from jax.experimental.pallas import tpu as pltpu


def _round_up(n, m):
    return ((n + m - 1) // m) * m


def _elman_kernel_factory(num_layers, h_pad):
    """Kernel for a fixed (static) number of stacked Elman layers."""

    def kernel(x_ref, h0_ref, wxb_ref, wh_ref, wo_ref, bo_ref, out_ref):
        # One MXU dot computes every layer's (x @ wx_i + b_i) at once:
        # x has a constant-1 lane, wxb packs [wx_i ; b_i ; 0] per layer block.
        xproj = jnp.dot(x_ref[...], wxb_ref[...],
                        preferred_element_type=jnp.float32)  # (BT, L*H_pad)

        h = h0_ref[...]                                       # (BT, H_pad)
        for i in range(num_layers):
            pre = (xproj[:, i * h_pad:(i + 1) * h_pad]
                   + jnp.dot(h, wh_ref[i], preferred_element_type=jnp.float32))
            h = jnp.tanh(pre)
            # Lane-dense, 128-aligned, unmasked store of this layer's hidden.
            out_ref[:, i * h_pad:(i + 1) * h_pad] = h

        # Output head: VPU multiply + XLU lane reduction (no N=1 MXU matmul).
        # Scalar bias comes from SMEM.
        y = jnp.sum(h * wo_ref[...], axis=-1, keepdims=True) + bo_ref[0, 0]
        out_ref[:, num_layers * h_pad:(num_layers + 1) * h_pad] = (
            jnp.broadcast_to(y, (h.shape[0], h_pad)))

    return kernel


def elman_forward(x, hidden_states, params, *, batch_tile=8):
    """Pallas equivalent of ElmanNet.forward(x, hidden_states).

    Returns (y, hidden_next) with y: (B, 1), hidden_next: list of (B, H).
    """
    layers = params["layers"]
    L = len(layers)
    H = layers[0][1].shape[0]
    # Same constraint as the PyTorch module: stacking only shape-checks when
    # consecutive hidden sizes are equal.
    assert all(wh.shape == (H, H) for (_, wh, _) in layers)

    B = x.shape[0]
    f32 = jnp.float32
    H_pad = _round_up(H, 128)           # lane alignment
    B_pad = _round_up(B, batch_tile)    # sublane / batch-tile alignment
    XK = 128                            # lane-padded width of [x0, x1, 1, 0, ...]

    # --- pad / repack operands (plain JAX; zero padding is exact) -----------
    x_pad = jnp.zeros((B_pad, XK), f32)
    x_pad = x_pad.at[:B, 0:2].set(x.astype(f32))
    x_pad = x_pad.at[:, 2].set(1.0)     # constant-1 lane folds the biases

    h0_pad = jnp.zeros((B_pad, H_pad), f32).at[:B, :H].set(
        hidden_states[0].astype(f32))

    blocks = []
    for (wx, _, b) in layers:
        blk = jnp.zeros((XK, H_pad), f32)
        blk = blk.at[0:2, :H].set(wx.astype(f32))
        blk = blk.at[2, :H].set(b.reshape(-1).astype(f32))
        blocks.append(blk)
    wxb_all = jnp.concatenate(blocks, axis=1)            # (128, L*H_pad)

    wh_all = jnp.zeros((L, H_pad, H_pad), f32)
    for i, (_, wh, _) in enumerate(layers):
        wh_all = wh_all.at[i, :H, :H].set(wh.astype(f32))

    wo_row = jnp.zeros((1, H_pad), f32).at[0, :H].set(
        params["wo"].reshape(-1).astype(f32))
    bo = params["bo"].reshape(1, 1).astype(f32)

    # --- fused kernel call ---------------------------------------------------
    kernel = _elman_kernel_factory(L, H_pad)
    out_shape = jax.ShapeDtypeStruct((B_pad, (L + 1) * H_pad), f32)
    grid = (B_pad // batch_tile,)

    slab = pl.pallas_call(
        kernel,
        out_shape=out_shape,
        grid=grid,
        in_specs=[
            pl.BlockSpec((batch_tile, XK), lambda i: (i, 0)),          # x
            pl.BlockSpec((batch_tile, H_pad), lambda i: (i, 0)),       # h0
            pl.BlockSpec((XK, L * H_pad), lambda i: (0, 0)),           # wx+b
            pl.BlockSpec((L, H_pad, H_pad), lambda i: (0, 0, 0)),      # wh
            pl.BlockSpec((1, H_pad), lambda i: (0, 0)),                # wo row
            pl.BlockSpec(memory_space=pltpu.MemorySpace.SMEM),         # bo scalar
        ],
        out_specs=pl.BlockSpec((batch_tile, (L + 1) * H_pad), lambda i: (i, 0)),
        compiler_params=pltpu.CompilerParams(
            dimension_semantics=("parallel",),
        ),
    )(x_pad, h0_pad, wxb_all, wh_all, wo_row, bo)

    # --- strip padding outside the kernel ------------------------------------
    hidden_next = [slab[:B, i * H_pad:i * H_pad + H] for i in range(L)]
    y = slab[:B, L * H_pad:L * H_pad + 1]
    return y, hidden_next


def elman_ref(x, hidden_states, params):
    """Pure-JAX reference mirroring the PyTorch forward exactly."""
    h = hidden_states[0]
    hiddens = []
    for (wx, wh, b) in params["layers"]:
        h = jnp.tanh(x @ wx + h @ wh + b)
        hiddens.append(h)
    y = hiddens[-1] @ params["wo"] + params["bo"]
    return y, hiddens


def init_params(key, hidden_sizes):
    """Deterministic synthetic init for nn.Linear(2 + H, H) layers + h2o."""
    layers = []
    for hs in hidden_sizes:
        key, k1, k2, k3 = jax.random.split(key, 4)
        scale = 1.0 / jnp.sqrt(2.0 + hs)
        wx = jax.random.uniform(k1, (2, hs), jnp.float32, -scale, scale)
        wh = jax.random.uniform(k2, (hs, hs), jnp.float32, -scale, scale)
        b = jax.random.uniform(k3, (1, hs), jnp.float32, -scale, scale)
        layers.append((wx, wh, b))
    key, k1, k2 = jax.random.split(key, 3)
    scale = 1.0 / jnp.sqrt(float(hidden_sizes[-1]))
    wo = jax.random.uniform(k1, (hidden_sizes[-1], 1), jnp.float32, -scale, scale)
    bo = jax.random.uniform(k2, (1, 1), jnp.float32, -scale, scale)
    return {"layers": layers, "wo": wo, "bo": bo}


def init_hidden(batch_size, hidden_sizes):
    return [jnp.zeros((batch_size, hs), jnp.float32) for hs in hidden_sizes]


if __name__ == "__main__":
    hidden_sizes = [32, 32]
    batch = 2

    key = jax.random.PRNGKey(0)
    key, kx, kh = jax.random.split(key, 3)
    params = init_params(key, hidden_sizes)

    x = jax.random.normal(kx, (batch, 2), jnp.float32)
    hidden_states = init_hidden(batch, hidden_sizes)
    # Non-trivial initial hidden state for a stronger correctness check.
    hidden_states[0] = jax.random.normal(kh, (batch, hidden_sizes[0]), jnp.float32)

    y, hidden_next = elman_forward(x, hidden_states, params)
    y = jax.block_until_ready(y)
    hidden_next = [jax.block_until_ready(h) for h in hidden_next]

    y_ref, hidden_ref = elman_ref(x, hidden_states, params)
    assert y.shape == (batch, 1)
    assert all(h.shape == (batch, hs) for h, hs in zip(hidden_next, hidden_sizes))
    assert jnp.allclose(y, y_ref, atol=1e-5, rtol=1e-5)
    for h, hr in zip(hidden_next, hidden_ref):
        assert jnp.allclose(h, hr, atol=1e-5, rtol=1e-5)

    print("KERNEL_OK")
</pallas_src>

<mosaic_0001>
module attributes {stable_mosaic.version = 11 : i64} {
  func.func @kernel(%arg0: i32, %arg1: memref<8x128xf32, #tpu.memory_space<vmem>>, %arg2: memref<8x128xf32, #tpu.memory_space<vmem>>, %arg3: memref<128x256xf32, #tpu.memory_space<vmem>>, %arg4: memref<2x128x128xf32, #tpu.memory_space<vmem>>, %arg5: memref<1x128xf32, #tpu.memory_space<vmem>>, %arg6: memref<1x1xf32, #tpu.memory_space<smem>>, %arg7: memref<8x384xf32, #tpu.memory_space<vmem>>) attributes {dimension_semantics = [#tpu.dimension_semantics<parallel>], iteration_bounds = array<i64: 1>, scalar_prefetch = 0 : i64, scratch_operands = 0 : i64, tpu.core_type = #tpu.core_type<tc>, window_params = [{transform_indices = @transform_0, window_bounds = array<i64: 8, 128>}, {transform_indices = @transform_1, window_bounds = array<i64: 8, 128>}, {pipeline_mode = #tpu.pipeline_mode<synchronous>, transform_indices = @transform_2, window_bounds = array<i64: 128, 256>}, {pipeline_mode = #tpu.pipeline_mode<synchronous>, transform_indices = @transform_3, window_bounds = array<i64: 2, 128, 128>}, {pipeline_mode = #tpu.pipeline_mode<synchronous>, transform_indices = @transform_4, window_bounds = array<i64: 1, 128>}, {transform_indices = @transform_5, window_bounds = array<i64: 1, 1>}, {transform_indices = @transform_6, window_bounds = array<i64: 8, 384>}]} {
    %c0 = arith.constant 0 : index
    %c0_0 = arith.constant 0 : index
    %0 = vector.load %arg1[%c0, %c0_0] : memref<8x128xf32, #tpu.memory_space<vmem>>, vector<8x128xf32>
    %c0_1 = arith.constant 0 : index
    %c0_2 = arith.constant 0 : index
    %1 = vector.load %arg3[%c0_1, %c0_2] : memref<128x256xf32, #tpu.memory_space<vmem>>, vector<128x256xf32>
    %cst = arith.constant dense<0.000000e+00> : vector<8x256xf32>
    %2 = tpu.matmul %0, %1, %cst {dimension_numbers = #tpu.dot_dimension_numbers<[1], [0], [0], [1], [0, 0, 1, 1], [], []>} : vector<8x128xf32>, vector<128x256xf32>, vector<8x256xf32> -> vector<8x256xf32>
    %c0_3 = arith.constant 0 : index
    %c0_4 = arith.constant 0 : index
    %3 = vector.load %arg2[%c0_3, %c0_4] : memref<8x128xf32, #tpu.memory_space<vmem>>, vector<8x128xf32>
    %4 = vector.extract_strided_slice %2 {offsets = [0, 0], sizes = [8, 128], strides = [1, 1]} : vector<8x256xf32> to vector<8x128xf32>
    %c0_5 = arith.constant 0 : index
    %c0_6 = arith.constant 0 : index
    %c0_7 = arith.constant 0 : index
    %5 = vector.load %arg4[%c0_5, %c0_6, %c0_7] : memref<2x128x128xf32, #tpu.memory_space<vmem>>, vector<1x128x128xf32>
    %6 = vector.shape_cast %5 : vector<1x128x128xf32> to vector<128x128xf32>
    %cst_8 = arith.constant dense<0.000000e+00> : vector<8x128xf32>
    %7 = tpu.matmul %3, %6, %cst_8 {dimension_numbers = #tpu.dot_dimension_numbers<[1], [0], [0], [1], [0, 0, 1, 1], [], []>} : vector<8x128xf32>, vector<128x128xf32>, vector<8x128xf32> -> vector<8x128xf32>
    %8 = arith.addf %4, %7 : vector<8x128xf32>
    %9 = math.tanh %8 : vector<8x128xf32>
    %c0_9 = arith.constant 0 : index
    %c0_10 = arith.constant 0 : index
    %10 = vector.load %arg7[%c0_9, %c0_10] : memref<8x384xf32, #tpu.memory_space<vmem>>, vector<8x128xf32>
    tpu.vector_store %arg7[%c0_9, %c0_10], %9 {strides = array<i32>} : memref<8x384xf32, #tpu.memory_space<vmem>>, vector<8x128xf32>,
    %11 = vector.extract_strided_slice %2 {offsets = [0, 128], sizes = [8, 128], strides = [1, 1]} : vector<8x256xf32> to vector<8x128xf32>
    %c1 = arith.constant 1 : index
    %c0_11 = arith.constant 0 : index
    %c0_12 = arith.constant 0 : index
    %12 = vector.load %arg4[%c1, %c0_11, %c0_12] : memref<2x128x128xf32, #tpu.memory_space<vmem>>, vector<1x128x128xf32>
    %13 = vector.shape_cast %12 : vector<1x128x128xf32> to vector<128x128xf32>
    %cst_13 = arith.constant dense<0.000000e+00> : vector<8x128xf32>
    %14 = tpu.matmul %9, %13, %cst_13 {dimension_numbers = #tpu.dot_dimension_numbers<[1], [0], [0], [1], [0, 0, 1, 1], [], []>} : vector<8x128xf32>, vector<128x128xf32>, vector<8x128xf32> -> vector<8x128xf32>
    %15 = arith.addf %11, %14 : vector<8x128xf32>
    %16 = math.tanh %15 : vector<8x128xf32>
    %c0_14 = arith.constant 0 : index
    %c128 = arith.constant 128 : index
    %17 = vector.load %arg7[%c0_14, %c128] : memref<8x384xf32, #tpu.memory_space<vmem>>, vector<8x128xf32>
    tpu.vector_store %arg7[%c0_14, %c128], %16 {strides = array<i32>} : memref<8x384xf32, #tpu.memory_space<vmem>>, vector<8x128xf32>,
    %c0_15 = arith.constant 0 : index
    %c0_16 = arith.constant 0 : index
    %18 = vector.load %arg5[%c0_15, %c0_16] : memref<1x128xf32, #tpu.memory_space<vmem>>, vector<1x128xf32>
    %19 = vector.broadcast %18 : vector<1x128xf32> to vector<8x128xf32>
    %20 = arith.mulf %16, %19 : vector<8x128xf32>
    %cst_17 = arith.constant dense<0.000000e+00> : vector<8xf32>
    %21 = vector.multi_reduction <add>, %20, %cst_17 [1] : vector<8x128xf32> to vector<8xf32>
    %22 = vector.shape_cast %21 : vector<8xf32> to vector<8x1xf32>
    %c0_18 = arith.constant 0 : index
    %c0_19 = arith.constant 0 : index
    %23 = memref.load %arg6[%c0_18, %c0_19] : memref<1x1xf32, #tpu.memory_space<smem>>
    %24 = vector.broadcast %23 : f32 to vector<8x1xf32>
    %25 = arith.addf %22, %24 : vector<8x1xf32>
    %26 = vector.shape_cast %25 : vector<8x1xf32> to vector<8x1xf32>
    %27 = vector.broadcast %26 : vector<8x1xf32> to vector<8x128xf32>
    %c0_20 = arith.constant 0 : index
    %c256 = arith.constant 256 : index
    %28 = vector.load %arg7[%c0_20, %c256] : memref<8x384xf32, #tpu.memory_space<vmem>>, vector<8x128xf32>
    tpu.vector_store %arg7[%c0_20, %c256], %27 {strides = array<i32>} : memref<8x384xf32, #tpu.memory_space<vmem>>, vector<8x128xf32>,
    return
  }
  func.func @transform_0(%arg0: i32) -> (i32, i32) {
    %c0_i32 = arith.constant 0 : i32
    %c0_i32_0 = arith.constant 0 : i32
    return %arg0, %c0_i32 : i32, i32
  }
  func.func @transform_1(%arg0: i32) -> (i32, i32) {
    %c0_i32 = arith.constant 0 : i32
    %c0_i32_0 = arith.constant 0 : i32
    return %arg0, %c0_i32 : i32, i32
  }
  func.func @transform_2(%arg0: i32) -> (i32, i32) {
    %c0_i32 = arith.constant 0 : i32
    %c0_i32_0 = arith.constant 0 : i32
    %c0_i32_1 = arith.constant 0 : i32
    return %c0_i32, %c0_i32_0 : i32, i32
  }
  func.func @transform_3(%arg0: i32) -> (i32, i32, i32) {
    %c0_i32 = arith.constant 0 : i32
    %c0_i32_0 = arith.constant 0 : i32
    %c0_i32_1 = arith.constant 0 : i32
    %c0_i32_2 = arith.constant 0 : i32
    return %c0_i32, %c0_i32_0, %c0_i32_1 : i32, i32, i32
  }
  func.func @transform_4(%arg0: i32) -> (i32, i32) {
    %c0_i32 = arith.constant 0 : i32
    %c0_i32_0 = arith.constant 0 : i32
    %c0_i32_1 = arith.constant 0 : i32
    return %c0_i32, %c0_i32_0 : i32, i32
  }
  func.func @transform_5(%arg0: i32) -> (i32, i32) {
    %c0_i32 = arith.constant 0 : i32
    %c0_i32_0 = arith.constant 0 : i32
    %c0_i32_1 = arith.constant 0 : i32
    return %c0_i32, %c0_i32_0 : i32, i32
  }
  func.func @transform_6(%arg0: i32) -> (i32, i32) {
    %c0_i32 = arith.constant 0 : i32
    %c0_i32_0 = arith.constant 0 : i32
    return %arg0, %c0_i32 : i32, i32
  }
}

</mosaic_0001>

<bundles_post_ra>
// kernel: tpu_custom_call.1
= control target key start
LH: loop header
LB: loop body
LE: loop exit
PB: predicated region body
PF: predicated region fallthrough
CT: control target
= control target key end

     0   :  { %12 = vsyncpa [#allocation4], 0  ;;  %s474_s0 = inlined_call_operand.hbm [shape: f32[8,128], index: 0, kind: input, shape index: {}]   ;;  %s475_s1 = inlined_call_operand.hbm [shape: f32[8,128], index: 1, kind: input, shape index: {}]   ;;  %s476_s2 = inlined_call_operand.hbm [shape: f32[128,256], index: 2, kind: input, shape index: {}]   ;;  %s477_s3 = inlined_call_operand.hbm [shape: f32[2,128,128], index: 3, kind: input, shape index: {}]   ;;  %s478_s4 = inlined_call_operand.vmem [shape: f32[1,128], index: 4, kind: input, shape index: {}]   ;;  %s479_s5 = inlined_call_operand.<no memory space> [shape: f32[1,1], index: 5, kind: input, shape index: {}]   ;;  %s480_s6 = inlined_call_operand.hbm [shape: f32[8,384], index: 6, kind: output, shape index: {}]  }
   0x1   :  { %13 = vsyncpa [#allocation7], 0 }
   0x2   :  { %14 = vsyncpa [#allocation10], 0  ;;  %s32_s23 = sshll.u32 %s475_s1, 4  ;;  %s33_s23 = int_to_ptr.hbm [resolvable:$true] %s32_s23 }
   0x3   :  { %15 = vsyncpa [#allocation5], 0  ;;  %s409_s24 = smov [#allocation6]   ;;  %s21_s28 = sshll.u32 %s474_s0, 4  ;;  %s22_s28 = int_to_ptr.hbm [resolvable:$true] %s21_s28 }
   0x4   :  { %s34_s25 = sshll.u32 %s409_s24, 4  ;;  %s410_s29 = smov [#allocation3]   ;;  %s35_s25 = int_to_ptr.vmem [resolvable:$true] %s34_s25 }
   0x5   :  { %37 = dma.hbm_to_vmem [thread:$0]  %s33_s23, 128, %s35_s25, [#allocation7]  }
   0x6   :  { %s23_s30 = sshll.u32 %s410_s29, 4  ;;  %s42_s9 = sshll.u32 %s476_s2, 4  ;;  %s24_s30 = int_to_ptr.vmem [resolvable:$true] %s23_s30  ;;  %s43_s9 = int_to_ptr.hbm [resolvable:$true] %s42_s9 }
   0x7   :  { %26 = dma.hbm_to_vmem [thread:$0]  %s22_s28, 128, %s24_s30, [#allocation4]  }
   0x8   :  { %s411_s1 = smov [#allocation8]   ;;  %s55_s13 = sshll.u32 %s477_s3, 4  ;;  %s56_s13 = int_to_ptr.hbm [resolvable:$true] %s55_s13 }
   0x9   :  { %s44_s10 = sshll.u32 %s411_s1, 4  ;;  %s412_s14 = smov 256   ;;  %s45_s10 = int_to_ptr.vmem [resolvable:$true] %s44_s10 }
   0xa   :  { %s413_s0 = smov 16   ;;  %s414_s15 = smov [#allocation9]  }
   0xb   :  { %50 = dma.hbm_to_vmem [thread:$0]  %s43_s9, 4096, %s45_s10, [#allocation7], %s412_s14, %s412_s14, %s413_s0  }
   0xc   :  { %s57_s16 = sshll.u32 %s414_s15, 4  ;;  %s415_s17 = smov 128   ;;  %s58_s16 = int_to_ptr.vmem [resolvable:$true] %s57_s16 }
   0xd   :  { %s416_s18 = smov 8  }
   0xe   :  { %63 = dma.hbm_to_vmem [thread:$0]  %s56_s13, 4096, %s58_s16, [#allocation10], %s415_s17, %s415_s17, %s416_s18  }
   0xf   :  { %401 = dma.done.wait [#allocation4], 128  }
  0x10   :  { %402 = vsyncadd [#allocation4], 4294967168 }
  0x11   :  { %403 = dma.done.wait [#allocation7], 4224  }
  0x12   :  { %404 = vsyncadd [#allocation7], 4294963072 }
  0x13   :  { %405 = dma.done.wait [#allocation10], 4096  }
  0x14   :  { %406 = vsyncadd [#allocation10], 4294963200  ;;  %v173_v0 = vld [vmem:[#allocation9 + $0x78] sm:$0xff]  ;;  %v172_v1 = vld [vmem:[#allocation9 + $0x70] sm:$0xff]  ;;  %s417_s21 = smov [#allocation11]   ;;  %s255_s25 = sshll.u32 %s480_s6, 4  ;;  %s256_s25 = int_to_ptr.hbm [resolvable:$true] %s255_s25 }
  0x15   :  { %174 = vmatpush.msra.mxu2 %v173_v0  ;;  %v115_v2 = vld [vmem:[#allocation8 + $0xf0] sm:$0xff]  ;;  %v113_v3 = vld [vmem:[#allocation8 + $0xe0] sm:$0xff]  ;;  %v171_v4 = vld [vmem:[#allocation9 + $0x68] sm:$0xff]  ;;  %s253_s22 = sshll.u32 %s417_s21, 4  ;;  %s254_s22 = int_to_ptr.vmem [resolvable:$true] %s253_s22 }
  0x16   :  { %117 = vmatpush.msra.mxu0 %v115_v2  ;;  %v111_v5 = vld [vmem:[#allocation8 + $0xd0] sm:$0xff]  ;;  %v170_v6 = vld [vmem:[#allocation9 + $0x60] sm:$0xff]  ;;  %v169_v8 = vld [vmem:[#allocation9 + $0x58] sm:$0xff] }
  0x17   :  { %175 = vmatpush.msra.mxu2 %v172_v1  ;;  %v109_v7 = vld [vmem:[#allocation8 + $0xc0] sm:$0xff]  ;;  %v107_v9 = vld [vmem:[#allocation8 + $0xb0] sm:$0xff]  ;;  %v167_v12 = vld [vmem:[#allocation9 + $0x48] sm:$0xff] }
  0x18   :  { %118 = vmatpush.msra.mxu0 %v113_v3  ;;  %v168_v10 = vld [vmem:[#allocation9 + $0x50] sm:$0xff]  ;;  %v105_v11 = vld [vmem:[#allocation8 + $0xa0] sm:$0xff]  ;;  %v213_v14 = vld [vmem:[#allocation9 + $0xf8] sm:$0xff] }
  0x19   :  { %176 = vmatpush.msra.mxu2 %v171_v4  ;;  %v103_v13 = vld [vmem:[#allocation8 + $0x90] sm:$0xff]  ;;  %v166_v16 = vld [vmem:[#allocation9 + $0x40] sm:$0xff]  ;;  %214 = vmatpush.msra.mxu3 %v213_v14  ;;  %v116_v17 = vld [vmem:[#allocation8 + $0xf8] sm:$0xff] }
  0x1a   :  { %119 = vmatpush.msra.mxu0 %v111_v5  ;;  %v212_v15 = vld [vmem:[#allocation9 + $0xf0] sm:$0xff]  ;;  %v101_v18 = vld [vmem:[#allocation8 + $0x80] sm:$0xff]  ;;  %v211_v19 = vld [vmem:[#allocation9 + $0xe8] sm:$0xff]  ;;  %137 = vmatpush.msra.mxu1 %v116_v17 }
  0x1b   :  { %177 = vmatpush.msra.mxu2 %v170_v6  ;;  %v114_v20 = vld [vmem:[#allocation8 + $0xe8] sm:$0xff]  ;;  %v165_v21 = vld [vmem:[#allocation9 + $0x38] sm:$0xff]  ;;  %215 = vmatpush.msra.mxu3 %v212_v15  ;;  %v99_v23 = vld [vmem:[#allocation8 + $0x70] sm:$0xff] }
  0x1c   :  { %120 = vmatpush.msra.mxu0 %v109_v7  ;;  %v112_v22 = vld [vmem:[#allocation8 + $0xd8] sm:$0xff]  ;;  %v210_v24 = vld [vmem:[#allocation9 + $0xe0] sm:$0xff]  ;;  %138 = vmatpush.msra.mxu1 %v114_v20  ;;  %v164_v25 = vld [vmem:[#allocation9 + $0x30] sm:$0xff] }
  0x1d   :  { %178 = vmatpush.msra.mxu2 %v169_v8  ;;  %216 = vmatpush.msra.mxu3 %v211_v19  ;;  %v110_v26 = vld [vmem:[#allocation8 + $0xc8] sm:$0xff]  ;;  %v97_v27 = vld [vmem:[#allocation8 + $0x60] sm:$0xff]  ;;  %v209_v28 = vld [vmem:[#allocation9 + $0xd8] sm:$0xff] }
  0x1e   :  { %121 = vmatpush.msra.mxu0 %v107_v9  ;;  %139 = vmatpush.msra.mxu1 %v112_v22  ;;  %v163_v29 = vld [vmem:[#allocation9 + $0x28] sm:$0xff]  ;;  %v108_v30 = vld [vmem:[#allocation8 + $0xb8] sm:$0xff]  ;;  %v95_v31 = vld [vmem:[#allocation8 + $0x50] sm:$0xff] }
  0x1f   :  { %179 = vmatpush.msra.mxu2 %v168_v10  ;;  %217 = vmatpush.msra.mxu3 %v210_v24  ;;  %v208_v32 = vld [vmem:[#allocation9 + $0xd0] sm:$0xff]  ;;  %v162_v33 = vld [vmem:[#allocation9 + $0x20] sm:$0xff]  ;;  %v106_v34 = vld [vmem:[#allocation8 + $0xa8] sm:$0xff] }
  0x20   :  { %122 = vmatpush.msra.mxu0 %v105_v11  ;;  %140 = vmatpush.msra.mxu1 %v110_v26  ;;  %v93_v35 = vld [vmem:[#allocation8 + $0x40] sm:$0xff]  ;;  %v207_v36 = vld [vmem:[#allocation9 + $0xc8] sm:$0xff]  ;;  %v161_v37 = vld [vmem:[#allocation9 + $0x18] sm:$0xff] }
  0x21   :  { %180 = vmatpush.msra.mxu2 %v167_v12  ;;  %218 = vmatpush.msra.mxu3 %v209_v28  ;;  %v104_v38 = vld [vmem:[#allocation8 + $0x98] sm:$0xff]  ;;  %v91_v39 = vld [vmem:[#allocation8 + $0x30] sm:$0xff]  ;;  %v206_v40 = vld [vmem:[#allocation9 + $0xc0] sm:$0xff]  ;;  %v245_v12 = vstv %s479_s5 }
  0x22   :  { %123 = vmatpush.msra.mxu0 %v103_v13  ;;  %141 = vmatpush.msra.mxu1 %v108_v30  ;;  %v160_v41 = vld [vmem:[#allocation9 + $0x10] sm:$0xff]  ;;  %v102_v42 = vld [vmem:[#allocation8 + $0x88] sm:$0xff]  ;;  %v89_v43 = vld [vmem:[#allocation8 + $0x20] sm:$0xff] }
  0x23   :  { %181 = vmatpush.msra.mxu2 %v166_v16  ;;  %219 = vmatpush.msra.mxu3 %v208_v32  ;;  %v205_v44 = vld [vmem:[#allocation9 + $0xb8] sm:$0xff]  ;;  %v159_v45 = vld [vmem:[#allocation9 + $0x8] sm:$0xff]  ;;  %v87_v46 = vld [vmem:[#allocation8 + $0x10] sm:$0xff] }
  0x24   :  { %124 = vmatpush.msra.mxu0 %v101_v18  ;;  %142 = vmatpush.msra.mxu1 %v106_v34  ;;  %v204_v47 = vld [vmem:[#allocation9 + $0xb0] sm:$0xff]  ;;  %v158_v48 = vld [vmem:[#allocation9] sm:$0xff]  ;;  %v157_v49 = vld [vmem:[#allocation6] sm:$0xff] }
  0x25   :  { %182 = vmatpush.msra.mxu2 %v165_v21  ;;  %220 = vmatpush.msra.mxu3 %v207_v36  ;;  %v85_v50 = vld [vmem:[#allocation8] sm:$0xff]  ;;  %v84_v51 = vld [vmem:[#allocation3] sm:$0xff]  ;;  %v203_v52 = vld [vmem:[#allocation9 + $0xa8] sm:$0xff] }
  0x26   :  { %125 = vmatpush.msra.mxu0 %v99_v23  ;;  %143 = vmatpush.msra.mxu1 %v104_v38  ;;  %v100_v53 = vld [vmem:[#allocation8 + $0x78] sm:$0xff]  ;;  %v202_v54 = vld [vmem:[#allocation9 + $0xa0] sm:$0xff]  ;;  %v98_v55 = vld [vmem:[#allocation8 + $0x68] sm:$0xff] }
  0x27   :  { %183 = vmatpush.msra.mxu2 %v164_v25  ;;  %221 = vmatpush.msra.mxu3 %v206_v40  ;;  %v201_v56 = vld [vmem:[#allocation9 + $0x98] sm:$0xff]  ;;  %v200_v58 = vld [vmem:[#allocation9 + $0x90] sm:$0xff]  ;;  %v94_v59 = vld [vmem:[#allocation8 + $0x48] sm:$0xff] }
  0x28   :  { %126 = vmatpush.msra.mxu0 %v97_v27  ;;  %144 = vmatpush.msra.mxu1 %v102_v42  ;;  %v96_v57 = vld [vmem:[#allocation8 + $0x58] sm:$0xff]  ;;  %v199_v60 = vld [vmem:[#allocation9 + $0x88] sm:$0xff]  ;;  %v198_v62 = vld [vmem:[#allocation9 + $0x80] sm:$0xff] }
  0x29   :  { %184 = vmatpush.msra.mxu2 %v163_v29  ;;  %222 = vmatpush.msra.mxu3 %v205_v44  ;;  %v92_v61 = vld [vmem:[#allocation8 + $0x38] sm:$0xff]  ;;  %v90_v63 = vld [vmem:[#allocation8 + $0x28] sm:$0xff]  ;;  %v276_v9 = vld [vmem:[%s478_s4] ss:$0 sm:$0xff] }
  0x2a   :  { %127 = vmatpush.msra.mxu0 %v95_v31  ;;  %145 = vmatpush.msra.mxu1 %v100_v53  ;;  %v88_v0 = vld [vmem:[#allocation8 + $0x18] sm:$0xff]  ;;  %v86_v1 = vld [vmem:[#allocation8 + $0x8] sm:$0xff] }
  0x2b   :  { %185 = vmatpush.msra.mxu2 %v162_v33  ;;  %223 = vmatpush.msra.mxu3 %v204_v47 }
  0x2c   :  { %128 = vmatpush.msra.mxu0 %v93_v35  ;;  %146 = vmatpush.msra.mxu1 %v98_v55 }
  0x2d   :  { %186 = vmatpush.msra.mxu2 %v161_v37  ;;  %224 = vmatpush.msra.mxu3 %v203_v52 }
  0x2e   :  { %129 = vmatpush.msra.mxu0 %v91_v39  ;;  %147 = vmatpush.msra.mxu1 %v96_v57 }
  0x2f   :  { %187 = vmatpush.msra.mxu2 %v160_v41  ;;  %225 = vmatpush.msra.mxu3 %v202_v54 }
  0x30   :  { %130 = vmatpush.msra.mxu0 %v89_v43  ;;  %148 = vmatpush.msra.mxu1 %v94_v59 }
  0x31   :  { %188 = vmatpush.msra.mxu2 %v159_v45  ;;  %226 = vmatpush.msra.mxu3 %v201_v56 }
  0x32   :  { %131 = vmatpush.msra.mxu0 %v87_v46  ;;  %149 = vmatpush.msra.mxu1 %v92_v61 }
  0x33   :  { %189 = vmatpush.msra.mxu2 %v158_v48  ;;  %227 = vmatpush.msra.mxu3 %v200_v58 }
  0x34   :  { %190 = vmatmul.f32.vlgmr.msra.gmra.mxu2 %v157_v49  ;;  %132 = vmatpush.msra.mxu0 %v85_v50 }
  0x35   :  { %133 = vmatmul.f32.vlgmr.msra.gmra.mxu0 %v84_v51  ;;  %228 = vmatpush.msra.mxu3 %v199_v60 }
  0x36   :  { %150 = vmatpush.msra.mxu1 %v90_v63 }
  0x37   :  { %229 = vmatpush.msra.mxu3 %v198_v62 }
  0x38   :  { %151 = vmatpush.msra.mxu1 %v88_v0 }
  0x3a   :  { %152 = vmatpush.msra.mxu1 %v86_v1 }
  0x3b   :  { %153 = vmatmul.f32.vlgmr.msra.gmra.mxu1 %v84_v51 }
  0xb2   :  { %v134_v2 = vpop.f32.mrf.mxu0 }
  0xb7   :  { %v191_v3 = vpop.f32.mrf.mxu2 }
  0xb8   :  { %v194_v4 = vadd.f32 %v191_v3, %v134_v2  ;;  %v154_v6 = vpop.f32.mrf.mxu1 }
  0xba   :  { %277 = vtanh.f32 %v194_v4 }
  0xc0   :  { %v278_v5 = vpop.eup %277 }
  0xc1   :  { %196 = vst [vmem:[#allocation11] sm:$0xff] %v278_v5  ;;  %230 = vmatmul.f32.vlgmr.msra.gmra.mxu3 %v278_v5 }
 0x144   :  { %v231_v7 = vpop.f32.mrf.mxu3 }
 0x145   :  { %v234_v8 = vadd.f32 %v231_v7, %v154_v6 }
 0x147   :  { %279 = vtanh.f32 %v234_v8 }
 0x14d   :  { %v280_v10 = vpop.eup %279 }
 0x14e   :  { %236 = vst [vmem:[#allocation11 + $0x8] sm:$0xff] %v280_v10  ;;  %v241_v11 = vmul.f32 %v280_v10, %v276_v9 }
 0x150   :  { %242 = vadd.xlane.f32.xlu0 %v241_v11 }
 0x1c3   :  { %v243_v13 = vpop.xlane.xlu0 %242 }
 0x1c4   :  { %v246_v14 = vadd.f32 %v245_v12, %v243_v13 }
 0x1c6   :  { %247 = vst [vmem:[#allocation11 + $0x10] sm:$0xff] %v246_v14 }
 0x1c7   :  { %258 = dma.vmem_to_hbm [thread:$0]  %s254_s22, 384, %s256_s25, [#allocation5]  }
 0x1c8   :  { %407 = dma.done.wait [#allocation5], 384  }
 0x1c9   :  { %408 = vsyncadd [#allocation5], 4294966912 }
 0x1ca   :  { %263 = vsyncpa [#allocation4], 1 }
 0x1cb   :  { %264 = vsyncpa [#allocation7], 1 }
 0x1cc   :  { %265 = vsyncpa [#allocation10], 1 }
 0x1cd   :  { %266 = vsyncpa [#allocation5], 1 }

</bundles_post_ra>
